<compile_context>
chip_gen: v6e
topology: v6e:2x2x1
jax: 0.10.0
libtpu: 0.0.40
codegen_flags: <defaults>
</compile_context>

<pallas_src>
import functools

import jax
import jax.numpy as jnp
from jax.experimental import pallas as pl
from jax.experimental.pallas import tpu as pltpu


def _round_up(v, k):
    return pl.cdiv(v, k) * k


def _mlp_kernel(x_ref, w1_ref, b1_ref, w2_ref, b2_ref, w3_ref, b3_ref, o_ref):
    # Memory-bound: keep compute simple.  The MXU accumulates in f32 even when
    # x is streamed as bf16 (preferred_element_type), so no explicit cast of x.
    x = x_ref[...]

    h = jnp.dot(x, w1_ref[...], preferred_element_type=jnp.float32) + b1_ref[...]
    h = jnp.maximum(h, 0.0)

    h = jnp.dot(h, w2_ref[...], preferred_element_type=jnp.float32) + b2_ref[...]
    h = jnp.maximum(h, 0.0)

    y = jnp.dot(h, w3_ref[...], preferred_element_type=jnp.float32) + b3_ref[...]
    o_ref[...] = y.astype(o_ref.dtype)


@functools.partial(jax.jit, static_argnames=("batch_tile", "stream_dtype"))
def encoder_decoder_forward(x, params, *, batch_tile=4096, stream_dtype=None):
    """x: [B, n+2].  params: dict of f32 weights/biases.

    batch_tile:   rows per grid step (rounded to a multiple of 8, clamped so
                  the grid has at least 2 steps for v7x's 2 TensorCores).
    stream_dtype: optional dtype (e.g. jnp.bfloat16) used to stream x through
                  HBM; compute accumulates in f32 and the output is written in
                  x.dtype.  bf16 streaming is the biggest relative win on v5e.
    """
    w1, b1 = params["w1"], params["b1"]   # (n+2, m), (1, m)
    w2, b2 = params["w2"], params["b2"]   # (m, m),   (1, m)
    w3, b3 = params["w3"], params["b3"]   # (m, n),   (1, n)

    B, d_in = x.shape
    m = w1.shape[1]
    n = w3.shape[1]
    out_dtype = x.dtype            # kernel writes the caller's dtype directly

    # ---- optional bf16 streaming of x (compute stays f32-accumulated) ------
    io_dtype = jnp.dtype(stream_dtype) if stream_dtype is not None else x.dtype
    xs = x if io_dtype == x.dtype else x.astype(io_dtype)

    # ---- batch tiling: multiple of 8, >= 2 grid steps, ragged tail masked --
    bt = _round_up(max(int(batch_tile), 8), 8)
    bt = min(bt, max(8, _round_up(pl.cdiv(B, 2), 8)))   # keep both v7x TCs busy
    grid = (pl.cdiv(B, bt),)       # partial last block: OOB rows are not written

    # ---- VMEM scoped limit: only raise it when the tiles actually need it --
    in_bytes = jnp.dtype(io_dtype).itemsize
    out_bytes = jnp.dtype(out_dtype).itemsize
    lane_in = _round_up(d_in, 128)
    lane_out = _round_up(n, 128)
    est = 2 * bt * (lane_in * in_bytes + lane_out * out_bytes)  # double-buffered x+y
    vmem_limit = None if est <= (12 << 20) else int(min(est + (4 << 20), 48 << 20))

    # ---- advisory cost estimate (long bandwidth-bound custom call) ---------
    flops = 2 * B * (d_in * m + m * m + m * n)
    bytes_accessed = (
        B * d_in * in_bytes
        + B * n * out_bytes
        + 4 * (w1.size + b1.size + w2.size + b2.size + w3.size + b3.size)
    )

    out = pl.pallas_call(
        _mlp_kernel,
        out_shape=jax.ShapeDtypeStruct((B, n), out_dtype),
        grid_spec=pltpu.PrefetchScalarGridSpec(
            num_scalar_prefetch=0,
            grid=grid,
            in_specs=[
                pl.BlockSpec((bt, d_in), lambda i: (i, 0)),   # x tile (streamed)
                pl.BlockSpec((d_in, m),  lambda i: (0, 0)),   # w1 (resident)
                pl.BlockSpec((1, m),     lambda i: (0, 0)),   # b1
                pl.BlockSpec((m, m),     lambda i: (0, 0)),   # w2
                pl.BlockSpec((1, m),     lambda i: (0, 0)),   # b2
                pl.BlockSpec((m, n),     lambda i: (0, 0)),   # w3 (resident)
                pl.BlockSpec((1, n),     lambda i: (0, 0)),   # b3
            ],
            out_specs=pl.BlockSpec((bt, n), lambda i: (i, 0)),
        ),
        compiler_params=pltpu.CompilerParams(
            dimension_semantics=("parallel",),   # v7x shards steps across 2 TCs
            vmem_limit_bytes=vmem_limit,
        ),
        cost_estimate=pl.CostEstimate(
            flops=flops, transcendentals=0, bytes_accessed=bytes_accessed),
    )(xs, w1, b1, w2, b2, w3, b3)

    return out


def init_params(key, n):
    """Deterministic init mimicking nn.Linear's U(-1/sqrt(fan_in), 1/sqrt(fan_in))."""
    m = n // 10
    d_in = n + 2
    ks = jax.random.split(key, 6)

    def linear(kw, kb, fan_in, fan_out):
        bound = 1.0 / jnp.sqrt(fan_in)
        w = jax.random.uniform(kw, (fan_in, fan_out), jnp.float32, -bound, bound)
        b = jax.random.uniform(kb, (1, fan_out), jnp.float32, -bound, bound)
        return w, b

    w1, b1 = linear(ks[0], ks[1], d_in, m)
    w2, b2 = linear(ks[2], ks[3], m, m)
    w3, b3 = linear(ks[4], ks[5], m, n)
    return {"w1": w1, "b1": b1, "w2": w2, "b2": b2, "w3": w3, "b3": b3}


def reference_forward(x, p):
    h = jnp.maximum(x @ p["w1"] + p["b1"], 0.0)
    h = jnp.maximum(h @ p["w2"] + p["b2"], 0.0)
    return h @ p["w3"] + p["b3"]


if __name__ == "__main__":
    n = 80                  # -> m = 8, input features = 82
    batch = 70              # deliberately not a multiple of any tile (ragged path)

    key = jax.random.PRNGKey(0)
    k_param, k_x = jax.random.split(key)
    params = init_params(k_param, n)
    x = jax.random.normal(k_x, (batch, n + 2), jnp.float32)

    ref = reference_forward(x, params)

    # Default path: tile clamps to a 2-step grid, last block partial (30 rows).
    out = encoder_decoder_forward(x, params)
    out = jax.block_until_ready(out)
    assert out.shape == (batch, n)
    assert out.dtype == x.dtype
    assert jnp.allclose(out, ref, atol=1e-4, rtol=1e-4), "f32 mismatch vs JAX reference"

    # Smaller tile -> 3 grid steps, 6-row ragged tail.
    out2 = encoder_decoder_forward(x, params, batch_tile=32)
    out2 = jax.block_until_ready(out2)
    assert jnp.allclose(out2, ref, atol=1e-4, rtol=1e-4), "tiled mismatch vs JAX reference"

    # bf16 x-streaming path (compute f32-accumulated, output written in f32).
    out3 = encoder_decoder_forward(x, params, batch_tile=32, stream_dtype=jnp.bfloat16)
    out3 = jax.block_until_ready(out3)
    assert out3.dtype == x.dtype
    assert jnp.allclose(out3, ref, atol=5e-2, rtol=5e-2), "bf16 mismatch vs JAX reference"

    print("KERNEL_OK")
</pallas_src>

<mosaic_0001>
module attributes {stable_mosaic.version = 11 : i64} {
  func.func @_mlp_kernel(%arg0: i32, %arg1: memref<40x82xf32, #tpu.memory_space<vmem>>, %arg2: memref<82x8xf32, #tpu.memory_space<vmem>>, %arg3: memref<1x8xf32, #tpu.memory_space<vmem>>, %arg4: memref<8x8xf32, #tpu.memory_space<vmem>>, %arg5: memref<1x8xf32, #tpu.memory_space<vmem>>, %arg6: memref<8x80xf32, #tpu.memory_space<vmem>>, %arg7: memref<1x80xf32, #tpu.memory_space<vmem>>, %arg8: memref<40x80xf32, #tpu.memory_space<vmem>>) attributes {dimension_semantics = [#tpu.dimension_semantics<parallel>], iteration_bounds = array<i64: 2>, scalar_prefetch = 0 : i64, scratch_operands = 0 : i64, tpu.core_type = #tpu.core_type<tc>, window_params = [{transform_indices = @transform_0, window_bounds = array<i64: 40, 82>}, {pipeline_mode = #tpu.pipeline_mode<synchronous>, transform_indices = @transform_1, window_bounds = array<i64: 82, 8>}, {pipeline_mode = #tpu.pipeline_mode<synchronous>, transform_indices = @transform_2, window_bounds = array<i64: 1, 8>}, {pipeline_mode = #tpu.pipeline_mode<synchronous>, transform_indices = @transform_3, window_bounds = array<i64: 8, 8>}, {pipeline_mode = #tpu.pipeline_mode<synchronous>, transform_indices = @transform_4, window_bounds = array<i64: 1, 8>}, {pipeline_mode = #tpu.pipeline_mode<synchronous>, transform_indices = @transform_5, window_bounds = array<i64: 8, 80>}, {pipeline_mode = #tpu.pipeline_mode<synchronous>, transform_indices = @transform_6, window_bounds = array<i64: 1, 80>}, {transform_indices = @transform_7, window_bounds = array<i64: 40, 80>}]} {
    %c0 = arith.constant 0 : index
    %c0_0 = arith.constant 0 : index
    %0 = vector.load %arg1[%c0, %c0_0] : memref<40x82xf32, #tpu.memory_space<vmem>>, vector<40x82xf32>
    %c0_1 = arith.constant 0 : index
    %c0_2 = arith.constant 0 : index
    %1 = vector.load %arg2[%c0_1, %c0_2] : memref<82x8xf32, #tpu.memory_space<vmem>>, vector<82x8xf32>
    %cst = arith.constant dense<0.000000e+00> : vector<40x8xf32>
    %2 = tpu.matmul %0, %1, %cst {dimension_numbers = #tpu.dot_dimension_numbers<[1], [0], [0], [1], [0, 0, 1, 1], [], []>} : vector<40x82xf32>, vector<82x8xf32>, vector<40x8xf32> -> vector<40x8xf32>
    %c0_3 = arith.constant 0 : index
    %c0_4 = arith.constant 0 : index
    %3 = vector.load %arg3[%c0_3, %c0_4] : memref<1x8xf32, #tpu.memory_space<vmem>>, vector<1x8xf32>
    %4 = vector.broadcast %3 : vector<1x8xf32> to vector<40x8xf32>
    %5 = arith.addf %2, %4 : vector<40x8xf32>
    %cst_5 = arith.constant 0.000000e+00 : f32
    %6 = vector.broadcast %cst_5 : f32 to vector<40x8xf32>
    %7 = arith.maximumf %5, %6 : vector<40x8xf32>
    %c0_6 = arith.constant 0 : index
    %c0_7 = arith.constant 0 : index
    %8 = vector.load %arg4[%c0_6, %c0_7] : memref<8x8xf32, #tpu.memory_space<vmem>>, vector<8x8xf32>
    %cst_8 = arith.constant dense<0.000000e+00> : vector<40x8xf32>
    %9 = tpu.matmul %7, %8, %cst_8 {dimension_numbers = #tpu.dot_dimension_numbers<[1], [0], [0], [1], [0, 0, 1, 1], [], []>} : vector<40x8xf32>, vector<8x8xf32>, vector<40x8xf32> -> vector<40x8xf32>
    %c0_9 = arith.constant 0 : index
    %c0_10 = arith.constant 0 : index
    %10 = vector.load %arg5[%c0_9, %c0_10] : memref<1x8xf32, #tpu.memory_space<vmem>>, vector<1x8xf32>
    %11 = vector.broadcast %10 : vector<1x8xf32> to vector<40x8xf32>
    %12 = arith.addf %9, %11 : vector<40x8xf32>
    %cst_11 = arith.constant 0.000000e+00 : f32
    %13 = vector.broadcast %cst_11 : f32 to vector<40x8xf32>
    %14 = arith.maximumf %12, %13 : vector<40x8xf32>
    %c0_12 = arith.constant 0 : index
    %c0_13 = arith.constant 0 : index
    %15 = vector.load %arg6[%c0_12, %c0_13] : memref<8x80xf32, #tpu.memory_space<vmem>>, vector<8x80xf32>
    %cst_14 = arith.constant dense<0.000000e+00> : vector<40x80xf32>
    %16 = tpu.matmul %14, %15, %cst_14 {dimension_numbers = #tpu.dot_dimension_numbers<[1], [0], [0], [1], [0, 0, 1, 1], [], []>} : vector<40x8xf32>, vector<8x80xf32>, vector<40x80xf32> -> vector<40x80xf32>
    %c0_15 = arith.constant 0 : index
    %c0_16 = arith.constant 0 : index
    %17 = vector.load %arg7[%c0_15, %c0_16] : memref<1x80xf32, #tpu.memory_space<vmem>>, vector<1x80xf32>
    %18 = vector.broadcast %17 : vector<1x80xf32> to vector<40x80xf32>
    %19 = arith.addf %16, %18 : vector<40x80xf32>
    %c0_17 = arith.constant 0 : index
    %c0_18 = arith.constant 0 : index
    %20 = vector.load %arg8[%c0_17, %c0_18] : memref<40x80xf32, #tpu.memory_space<vmem>>, vector<40x80xf32>
    tpu.vector_store %arg8[%c0_17, %c0_18], %19 {strides = array<i32>} : memref<40x80xf32, #tpu.memory_space<vmem>>, vector<40x80xf32>,
    return
  }
  func.func @transform_0(%arg0: i32) -> (i32, i32) {
    %c0_i32 = arith.constant 0 : i32
    %c0_i32_0 = arith.constant 0 : i32
    return %arg0, %c0_i32 : i32, i32
  }
  func.func @transform_1(%arg0: i32) -> (i32, i32) {
    %c0_i32 = arith.constant 0 : i32
    %c0_i32_0 = arith.constant 0 : i32
    %c0_i32_1 = arith.constant 0 : i32
    return %c0_i32, %c0_i32_0 : i32, i32
  }
  func.func @transform_2(%arg0: i32) -> (i32, i32) {
    %c0_i32 = arith.constant 0 : i32
    %c0_i32_0 = arith.constant 0 : i32
    %c0_i32_1 = arith.constant 0 : i32
    return %c0_i32, %c0_i32_0 : i32, i32
  }
  func.func @transform_3(%arg0: i32) -> (i32, i32) {
    %c0_i32 = arith.constant 0 : i32
    %c0_i32_0 = arith.constant 0 : i32
    %c0_i32_1 = arith.constant 0 : i32
    return %c0_i32, %c0_i32_0 : i32, i32
  }
  func.func @transform_4(%arg0: i32) -> (i32, i32) {
    %c0_i32 = arith.constant 0 : i32
    %c0_i32_0 = arith.constant 0 : i32
    %c0_i32_1 = arith.constant 0 : i32
    return %c0_i32, %c0_i32_0 : i32, i32
  }
  func.func @transform_5(%arg0: i32) -> (i32, i32) {
    %c0_i32 = arith.constant 0 : i32
    %c0_i32_0 = arith.constant 0 : i32
    %c0_i32_1 = arith.constant 0 : i32
    return %c0_i32, %c0_i32_0 : i32, i32
  }
  func.func @transform_6(%arg0: i32) -> (i32, i32) {
    %c0_i32 = arith.constant 0 : i32
    %c0_i32_0 = arith.constant 0 : i32
    %c0_i32_1 = arith.constant 0 : i32
    return %c0_i32, %c0_i32_0 : i32, i32
  }
  func.func @transform_7(%arg0: i32) -> (i32, i32) {
    %c0_i32 = arith.constant 0 : i32
    %c0_i32_0 = arith.constant 0 : i32
    return %arg0, %c0_i32 : i32, i32
  }
}

</mosaic_0001>

<bundles_post_ra>
// kernel: encoder_decoder_forward.1
= control target key start
LH: loop header
LB: loop body
LE: loop exit
PB: predicated region body
PF: predicated region fallthrough
CT: control target
= control target key end

     0   :  { %12 = vsyncpa [#allocation3], 0  ;;  %s1273_s0 = inlined_call_operand.vmem [shape: f32[70,82], index: 0, kind: input, shape index: {}]   ;;  %s1274_s1 = inlined_call_operand.vmem [shape: f32[82,8], index: 1, kind: input, shape index: {}]   ;;  %s1275_s2 = inlined_call_operand.vmem [shape: f32[1,8], index: 2, kind: input, shape index: {}]   ;;  %s1276_s3 = inlined_call_operand.vmem [shape: f32[8,8], index: 3, kind: input, shape index: {}]   ;;  %s1277_s4 = inlined_call_operand.vmem [shape: f32[1,8], index: 4, kind: input, shape index: {}]   ;;  %s1278_s5 = inlined_call_operand.vmem [shape: f32[8,80], index: 5, kind: input, shape index: {}]   ;;  %s1279_s6 = inlined_call_operand.vmem [shape: f32[1,80], index: 6, kind: input, shape index: {}]   ;;  %s1280_s7 = inlined_call_operand.hbm [shape: f32[70,80], index: 7, kind: output, shape index: {}]  }
   0x1   :  { %14 = vsyncpa [#allocation3 + $0x1], 0  ;;  %s1043_s24 = smov 0   ;;  %s1045_s25 = smov 0  }
   0x2   :  { %s1047_s26 = smov 0   ;;  %s1049_s27 = smov 0  }
   0x3 LB: > { %s1064_s28 = sadd.s32 4294967295, %s996_s27   ;;  %s762_s29 = sadd.s32 4294967294, %s996_s27   ;;  %s996_s27 = sphi %s1049_s27, %s1286_s27   ;;  %s992_s26 = sphi %s1047_s26, %s1285_s26   ;;  %s988_s25 = sphi %s1045_s25, %s1284_s25   ;;  %s984_s24 = sphi %s1043_s24, %s1283_s24  }
   0x4   : > { %s1068_s30 = sadd.s32 1, %s996_s27   ;;  %s179_s8 = sadd.s32 1, %s992_s26 }
   0x5   : > { %s176_s9 = ssub.s32 %s996_s27, %s1068_s30  ;;  %p189_p0 = scmp.ne.s32.totalorder %s992_s26, %s988_s25 }
   0x6   : > { %p177_p1 = scmp.eq.s32.totalorder %s176_s9, 0  ;;  %p190_p2 = scmp.eq.s32.totalorder %s1064_s28, 1 }
   0x7   : > { %p195_p3 = scmp.ne.s32.totalorder %s988_s25, %s984_s24  ;;  %p196_p4 = scmp.eq.s32.totalorder %s762_s29, 1 }
   0x8   : > { %s1079_s10 = scalar_select %p177_p1, %s992_s26, %s179_s8  }
   0x9   : > { %p1081_p5 = por %p190_p2, %p189_p0  ;;  %p1085_p6 = por %p196_p4, %p195_p3 }
   0xa   : > { %p765_p7 = scmp.ge.s32.totalorder %s996_s27, 1  ;;  %p249_p8 = scmp.lt.s32.totalorder %s996_s27, 3 }
   0xc   : > { %p250_p9 = pnand %p765_p7, %p249_p8 }
   0xd   : > { %s1102_s17 = smul.u32 (!%p250_p9), 5, %s1064_s28  ;;  %s282_s23 = sand.u32 (!%p250_p9), 1, %s988_s25  }
   0xe   : > { %253 = sbr.rel (%p250_p9) target bundleno = 675 (0x2a3), region = 48  ;;  %s1213_s14 = scalar_lea.sflag (!%p250_p9), [#allocation3], %s282_s23 }
   0xf   : > { %p290_p10 = scmp.lt.s32.totalorder (!%p250_p9), %s1102_s17, 8  ;;  %s893_s29 = smul.u32 (!%p250_p9), 40, %s282_s23 }
  0x11   : > { %s1201_s13 = scalar_lea.vmem (!%p250_p9), [#allocation2], %s893_s29 }
  0x13   : > { %v319_v0 = vld [vmem:[%s1274_s1 + $0x50] sm:$0x3]  ;;  %vm343_vm0 = vcmask 1041408   ;;  %v998_v1 = vmov 0.0   ;;  %v318_v2 = vld [vmem:[%s1274_s1 + $0x48] sm:$0xff]  ;;  %vm999_vm1 = vmmov 0  }
  0x14   : > { %822 = vmatprep.subr.mxu0 %v998_v1  ;;  %859 = vmatprep.subr.mxu1 %v998_v1  ;;  %v317_v3 = vld [vmem:[%s1274_s1 + $0x40] sm:$0xff]  ;;  %v316_v4 = vld [vmem:[%s1274_s1 + $0x38] sm:$0xff]  ;;  %v315_v5 = vld [vmem:[%s1274_s1 + $0x30] sm:$0xff]  ;;  %s291_s9 = scalar_select %p290_p10, %s1102_s17, 8  ;;  %vm327_vm2 = vcmask 670720   ;;  %vm450_vm3 = vcmask 64512  }
  0x15   : > { %823 = vmatpush3.msk.msra.mxu0 %vm343_vm0, %v319_v0  ;;  %844 = vmatprep.mubr.msk.f32.mxu0 %vm999_vm1, %v998_v1  ;;  %v314_v6 = vld [vmem:[%s1274_s1 + $0x28] sm:$0xff]  ;;  %v313_v7 = vld [vmem:[%s1274_s1 + $0x20] sm:$0xff]  ;;  %v312_v8 = vld [vmem:[%s1274_s1 + $0x18] sm:$0xff]  ;;  %vm674_vm4 = vcmask 654336   ;;  %s689_s15 = ssub.s32 (%p1081_p5), 9, %s1102_s17 }
  0x16   : > { %824 = vmatprep.subr.mxu0 %v998_v1  ;;  %861 = vmatprep.mubr.msk.f32.mxu1 %vm999_vm1, %v998_v1  ;;  %s766_s18 = sshll.u32 %s291_s9, 3  ;;  %v311_v9 = vld [vmem:[%s1274_s1 + $0x10] sm:$0xff]  ;;  %v310_v10 = vld [vmem:[%s1274_s1 + $0x8] sm:$0xff]  ;;  %v309_v11 = vld [vmem:[%s1274_s1] sm:$0xff]  ;;  %p690_p11 = scmp.lt.s32.totalorder (%p1081_p5), %s689_s15, 5 }
  0x17   : > { %825 = vmatpush3.msra.mxu0 %v318_v2  ;;  %s293_s8 = scalar_lea.vmem %s1273_s0, %s766_s18  ;;  %v442_v17 = vld [vmem:[%s1276_s3] sm:$0xff] }
  0x18   : > { %826 = vmatprep.subr.mxu0 %v998_v1  ;;  %v304_v12 = vld [vmem:[%s293_s8] sm:$0xff]  ;;  %v305_v13 = vld [vmem:[%s293_s8 + $0x8] sm:$0xff]  ;;  %v306_v14 = vld [vmem:[%s293_s8 + $0x10] sm:$0xff]  ;;  %860 = vmatpush3.msra.mxu1 %v442_v17 }
  0x19   : > { %827 = vmatpush3.msra.mxu0 %v317_v3  ;;  %v307_v15 = vld [vmem:[%s293_s8 + $0x18] sm:$0xff]  ;;  %v308_v16 = vld [vmem:[%s293_s8 + $0x20] sm:$0xff]  ;;  %876 = vmatprep.subr.mxu1 %v998_v1 }
  0x1a   : > { %828 = vmatprep.subr.mxu0 %v998_v1  ;;  %v767_v18 = vld [vmem:[%s1275_s2] ss:$0 sm:$0xff] }
  0x1b   : > { %829 = vmatpush3.msra.mxu0 %v316_v4  ;;  %v561_v23 = vld [vmem:[%s1278_s5] sm:$0xff] }
  0x1c   : > { %830 = vmatprep.subr.mxu0 %v998_v1  ;;  %v774_v40 = vld [vmem:[%s1277_s4] ss:$0 sm:$0xff] }
  0x1d   : > { %831 = vmatpush3.msra.mxu0 %v315_v5  ;;  %v780_v61 = vld [vmem:[%s1279_s6] ss:$0 sm:$0xff] }
  0x1e   : > { %832 = vmatprep.subr.mxu0 %v998_v1 }
  0x1f   : > { %833 = vmatpush3.msra.mxu0 %v314_v6 }
  0x20   : > { %834 = vmatprep.subr.mxu0 %v998_v1 }
  0x21   : > { %835 = vmatpush3.msra.mxu0 %v313_v7 }
  0x22   : > { %836 = vmatprep.subr.mxu0 %v998_v1 }
  0x23   : > { %837 = vmatpush3.msra.mxu0 %v312_v8 }
  0x24   : > { %838 = vmatprep.subr.mxu0 %v998_v1 }
  0x25   : > { %839 = vmatpush3.msra.mxu0 %v311_v9 }
  0x26   : > { %840 = vmatprep.subr.mxu0 %v998_v1 }
  0x27   : > { %841 = vmatpush3.msra.mxu0 %v310_v10 }
  0x28   : > { %842 = vmatprep.subr.mxu0 %v998_v1 }
  0x29   : > { %843 = vmatpush3.msra.mxu0 %v309_v11 }
  0x2a   : > { %845 = vmatmul.mubr.msk.f32.vlgmr.msra.gmra.mxu0 %vm327_vm2, %v304_v12 }
  0x2b   : > { %847 = vmatprep.mubr.msk.f32.mxu0 %vm999_vm1, %v998_v1 }
  0x2e   : > { %848 = vmatmul.mubr.msk.f32.gmra.mxu0 %vm327_vm2, %v305_v13 }
  0x2f   : > { %850 = vmatprep.mubr.msk.f32.mxu0 %vm999_vm1, %v998_v1 }
  0x32   : > { %851 = vmatmul.mubr.msk.f32.gmra.mxu0 %vm327_vm2, %v306_v14 }
  0x33   : > { %853 = vmatprep.mubr.msk.f32.mxu0 %vm999_vm1, %v998_v1 }
  0x36   : > { %854 = vmatmul.mubr.msk.f32.gmra.mxu0 %vm327_vm2, %v307_v15 }
  0x37   : > { %856 = vmatprep.mubr.msk.f32.mxu0 %vm999_vm1, %v998_v1 }
  0x3a   : > { %857 = vmatmul.mubr.msk.f32.gmra.mxu0 %vm327_vm2, %v308_v16 }
  0xea   : > { %v413_v19 = vpop.f32.mrf.mxu0 }
  0xeb   : > { %v414_v20 = vadd.f32 %v767_v18, %v413_v19 }
  0xec   : > { %v846_v21 = vpop.f32.mrf.mxu0 }
  0xed   : > { %v437_v22 = vmax.f32 %v414_v20, 0.0 }
  0xee   : > { %v418_v24 = vpop.f32.mrf.mxu0 }
  0xef   : > { %v419_v25 = vadd.f32 %v767_v18, %v418_v24  ;;  %862 = vmatmul.mubr.msk.f32.vlgmr.msra.gmra.mxu1 %vm450_vm3, %v437_v22 }
  0xf0   : > { %v849_v26 = vpop.f32.mrf.mxu0  ;;  %864 = vmatprep.mubr.msk.f32.mxu1 %vm999_vm1, %v998_v1  ;;  %877 = vmatpush3.msra.mxu1 %v561_v23 }
  0xf1   : > { %v438_v27 = vmax.f32 %v419_v25, 0.0 }
  0xf2   : > { %v423_v28 = vpop.f32.mrf.mxu0 }
  0xf3   : > { %v424_v29 = vadd.f32 %v767_v18, %v423_v28  ;;  %865 = vmatmul.mubr.msk.f32.gmra.mxu1 %vm450_vm3, %v438_v27 }
  0xf4   : > { %v852_v30 = vpop.f32.mrf.mxu0  ;;  %867 = vmatprep.mubr.msk.f32.mxu1 %vm999_vm1, %v998_v1 }
  0xf5   : > { %v439_v31 = vmax.f32 %v424_v29, 0.0 }
  0xf6   : > { %v428_v32 = vpop.f32.mrf.mxu0 }
  0xf7   : > { %v429_v33 = vadd.f32 %v767_v18, %v428_v32  ;;  %868 = vmatmul.mubr.msk.f32.gmra.mxu1 %vm450_vm3, %v439_v31 }
  0xf8   : > { %v855_v34 = vpop.f32.mrf.mxu0  ;;  %870 = vmatprep.mubr.msk.f32.mxu1 %vm999_vm1, %v998_v1 }
  0xf9   : > { %v440_v35 = vmax.f32 %v429_v33, 0.0 }
  0xfa   : > { %v433_v36 = vpop.f32.mrf.mxu0 }
  0xfb   : > { %v434_v37 = vadd.f32 %v767_v18, %v433_v36  ;;  %871 = vmatmul.mubr.msk.f32.gmra.mxu1 %vm450_vm3, %v440_v35 }
  0xfc   : > { %v858_v38 = vpop.f32.mrf.mxu0  ;;  %873 = vmatprep.mubr.msk.f32.mxu1 %vm999_vm1, %v998_v1 }
  0xfd   : > { %v441_v39 = vmax.f32 %v434_v37, 0.0 }
  0xff   : > { %874 = vmatmul.mubr.msk.f32.gmra.mxu1 %vm450_vm3, %v441_v39 }
 0x100   : > { %878 = vmatprep.mubr.msk.f32.mxu1 %vm999_vm1, %v998_v1 }
 0x1af   : > { %v532_v41 = vpop.f32.mrf.mxu1 }
 0x1b0   : > { %v533_v42 = vadd.f32 %v774_v40, %v532_v41 }
 0x1b1   : > { %v863_v43 = vpop.f32.mrf.mxu1 }
 0x1b2   : > { %v556_v44 = vmax.f32 %v533_v42, 0.0 }
 0x1b3   : > { %v537_v45 = vpop.f32.mrf.mxu1 }
 0x1b4   : > { %v538_v46 = vadd.f32 %v774_v40, %v537_v45  ;;  %879 = vmatmul.mubr.msk.f32.vlgmr.msra.gmra.mxu1 %vm450_vm3, %v556_v44 }
 0x1b5   : > { %v866_v47 = vpop.f32.mrf.mxu1  ;;  %881 = vmatprep.mubr.msk.f32.mxu1 %vm999_vm1, %v998_v1 }
 0x1b6   : > { %v557_v48 = vmax.f32 %v538_v46, 0.0 }
 0x1b7   : > { %v542_v49 = vpop.f32.mrf.mxu1 }
 0x1b8   : > { %v543_v50 = vadd.f32 %v774_v40, %v542_v49  ;;  %882 = vmatmul.mubr.msk.f32.gmra.mxu1 %vm450_vm3, %v557_v48 }
 0x1b9   : > { %v869_v51 = vpop.f32.mrf.mxu1  ;;  %884 = vmatprep.mubr.msk.f32.mxu1 %vm999_vm1, %v998_v1 }
 0x1ba   : > { %v558_v52 = vmax.f32 %v543_v50, 0.0 }
 0x1bb   : > { %v547_v53 = vpop.f32.mrf.mxu1 }
 0x1bc   : > { %v548_v54 = vadd.f32 %v774_v40, %v547_v53  ;;  %885 = vmatmul.mubr.msk.f32.gmra.mxu1 %vm450_vm3, %v558_v52 }
 0x1bd   : > { %v872_v55 = vpop.f32.mrf.mxu1  ;;  %887 = vmatprep.mubr.msk.f32.mxu1 %vm999_vm1, %v998_v1 }
 0x1be   : > { %v559_v56 = vmax.f32 %v548_v54, 0.0 }
 0x1bf   : > { %v552_v57 = vpop.f32.mrf.mxu1 }
 0x1c0   : > { %v553_v58 = vadd.f32 %v774_v40, %v552_v57  ;;  %888 = vmatmul.mubr.msk.f32.gmra.mxu1 %vm450_vm3, %v559_v56 }
 0x1c1   : > { %v875_v59 = vpop.f32.mrf.mxu1  ;;  %890 = vmatprep.mubr.msk.f32.mxu1 %vm999_vm1, %v998_v1 }
 0x1c2   : > { %v560_v60 = vmax.f32 %v553_v58, 0.0 }
 0x1c4   : > { %891 = vmatmul.mubr.msk.f32.gmra.mxu1 %vm450_vm3, %v560_v60 }
 0x274   : > { %v650_v62 = vpop.f32.mrf.mxu1 }
 0x275   : > { %v651_v63 = vadd.f32 %v780_v61, %v650_v62 }
 0x276   : > { %v880_v0 = vpop.f32.mrf.mxu1 }
 0x277   : > { %675 = vst.msk [vmem:[%s1201_s13] sm:$0xff] %vm674_vm4, %v651_v63 }
 0x278   : > { %v655_v1 = vpop.f32.mrf.mxu1 }
 0x279   : > { %v656_v2 = vadd.f32 %v780_v61, %v655_v1 }
 0x27a   : > { %v883_v3 = vpop.f32.mrf.mxu1 }
 0x27b   : > { %676 = vst.msk [vmem:[%s1201_s13 + $0x8] sm:$0xff] %vm674_vm4, %v656_v2 }
 0x27c   : > { %v660_v4 = vpop.f32.mrf.mxu1 }
 0x27d   : > { %v661_v5 = vadd.f32 %v780_v61, %v660_v4 }
 0x27e   : > { %v886_v6 = vpop.f32.mrf.mxu1 }
 0x27f   : > { %677 = vst.msk [vmem:[%s1201_s13 + $0x10] sm:$0xff] %vm674_vm4, %v661_v5 }
 0x280   : > { %v665_v7 = vpop.f32.mrf.mxu1 }
 0x281   : > { %v666_v8 = vadd.f32 %v780_v61, %v665_v7 }
 0x282   : > { %v889_v9 = vpop.f32.mrf.mxu1 }
 0x283   : > { %678 = vst.msk [vmem:[%s1201_s13 + $0x18] sm:$0xff] %vm674_vm4, %v666_v8  ;;  %687 = sbr.rel (!%p1081_p5) target bundleno = 675 (0x2a3), region = 52 }
 0x284   : > { %v670_v10 = vpop.f32.mrf.mxu1 }
 0x285   : > { %v671_v11 = vadd.f32 %v780_v61, %v670_v10 }
 0x286   : > { %v892_v12 = vpop.f32.mrf.mxu1 }
 0x287   : > { %679 = vst.msk [vmem:[%s1201_s13 + $0x20] sm:$0xff] %vm674_vm4, %v671_v11 }
 0x288   : > { %s1288_s15 = smov (!%p690_p11, %s689_s15), 5 }
 0x289   : > { %s1218_s16 = sshll.u32 %s1288_s15, 7 }
 0x28a   : > { %s694_s18 = ssub.s32 640, %s1218_s16 }
 0x28b   : > { %695 = vsyncadd %s1213_s14, %s694_s18  ;;  %p787_p12 = scmp.ne.s32.totalorder %s1218_s16, 0  ;;  %s793_s19 = smul.u32 640, %s1064_s28 }
 0x28c   : > { %s700_s20 = sshll.u32 %s1201_s13, 4  ;;  %s1000_s23 = smov [#allocation2]   ;;  %s1230_s20 = int_to_ptr.vmem [resolvable:$true] %s700_s20 }
 0x28d   : > { %s1228_s22 = scalar_lea.hbm %s1280_s7, %s793_s19  ;;  %s936_s17 = scalar_lea.vmem %s1230_s20, %s1218_s16 }
 0x28e   : > { %p937_p13 = scmp.ne.s32.totalorder %s1230_s20, %s936_s17  ;;  %s940_s29 = sshll.u32 %s1000_s23, 4  ;;  %s941_s29 = int_to_ptr.vmem [resolvable:$false] %s940_s29 }
 0x28f   : > { %s942_s28 = scalar_lea.vmem %s941_s29, 1280  ;;  %p943_p2 = scmp.lt.s32.totalorder %s1230_s20, %s941_s29 }
 0x290   : > { %p938_p0 = pnand %p937_p13, %p787_p12  ;;  %p944_p3 = scmp.lt.s32.totalorder %s942_s28, %s936_s17 }
 0x292   : > { %p939_p1 = pneg %p938_p0  ;;  %p945_p4 = por %p944_p3, %p943_p2 }
 0x294   : > { %p946_p5 = pnand %p945_p4, %p939_p1 }
 0x296   : > { %949 = shalt.err (!%p946_p5)
}
 0x297   : > { %s950_s8 = scalar_lea.hbm %s1228_s22, %s1218_s16  ;;  %s954_s15 = scalar_lea.hbm %s1280_s7, 1152 }
 0x298   : > { %p951_p7 = scmp.ne.s32.totalorder %s1228_s22, %s950_s8  ;;  %p955_p10 = scmp.lt.s32.totalorder %s1228_s22, %s1280_s7 }
 0x299   : > { %p956_p11 = scmp.lt.s32.totalorder %s954_s15, %s950_s8 }
 0x29a   : > { %p952_p8 = pnand %p951_p7, %p787_p12 }
 0x29b   : > { %p957_p13 = por %p956_p11, %p955_p10 }
 0x29c   : > { %p953_p9 = pneg %p952_p8 }
 0x29e   : > { %p958_p0 = pnand %p957_p13, %p953_p9 }
 0x2a0   : > { %961 = shalt.err (!%p958_p0)
}
 0x2a1   : > { %s1001_s11 = smov 128   ;;  %s1002_s21 = smov 8  }
 0x2a2   : > { %706 = dma.vmem_to_hbm [thread:$0]  (%p787_p12), %s1230_s20, %s1218_s16, %s1228_s22, %s1213_s14, %s1001_s11, %s1001_s11, %s1002_s21  }
 0x2a3 PF: > { %p899_p1 = scmp.ge.s32.totalorder %s996_s27, 2  ;;  %s715_s17 = sand.u32 1, %s984_s24  }
 0x2a4   : > { %s716_s23 = scalar_lea.sflag [#allocation3], %s715_s17 }
 0x2a5   : > { %p896_p2 = pnand %p899_p1, %p1085_p6 }
 0x2a7   : > { %p897_p3 = pneg %p896_p2 }
 0x2a9   : > { %979 = dma.done.wait (%p897_p3), %s716_s23, 640  }
 0x2aa   : > { %981 = vsyncadd (%p897_p3), %s716_s23, 4294966656  ;;  %p17_p4 = scmp.ge.s32.totalorder %s1068_s30, 4   ;;  %s1283_s24 = smov %s988_s25 }
 0x2ab   : > { %s1284_s25 = smov %s992_s26  ;;  %s1285_s26 = smov %s1079_s10 }
 0x2ac   : > { %s1286_s27 = smov %s1068_s30  ;;  %19 = sbr.rel (!%p17_p4) target bundleno = 3 (0x3), region = 83 }
 0x2b1   :  { %721 = vsyncpa [#allocation3], 1 }
 0x2b2   :  { %723 = vsyncpa [#allocation3 + $0x1], 1 }

</bundles_post_ra>
